<compile_context>
chip_gen: v6e
topology: v6e:2x2x1
jax: 0.10.0
libtpu: 0.0.40
codegen_flags: <defaults>
</compile_context>

<pallas_src>
import jax
import jax.numpy as jnp
from jax import lax
from jax.experimental import pallas as pl
from jax.experimental.pallas import tpu as pltpu


def _sigmoid(z):
    # exp/recip go to the EUP slot; safe Mosaic lowering.
    return 1.0 / (1.0 + jnp.exp(-z))


def lstm_kernel(x_ref, w_ih_ref, w_hh_ref, b_g_ref, fc_w_ref, fc_b_ref,
                o_ref, h_ref, c_ref):
    t = pl.program_id(0)
    H = h_ref.shape[1]

    @pl.when(t == 0)
    def _():
        h_ref[...] = jnp.zeros_like(h_ref)
        c_ref[...] = jnp.zeros_like(c_ref)

    x_t = x_ref[0]                                # [B, D_in] (time dim of block is 1)

    # gates = x_t @ W_ih^T + h @ W_hh^T + (b_ih + b_hh)
    # Contract the K axis of the native [4H, K] layouts directly on the MXU.
    dn = (((1,), (1,)), ((), ()))
    gates = lax.dot_general(x_t, w_ih_ref[...], dimension_numbers=dn,
                            preferred_element_type=jnp.float32)
    gates += lax.dot_general(h_ref[...], w_hh_ref[...], dimension_numbers=dn,
                             preferred_element_type=jnp.float32)
    gates += b_g_ref[...]

    # PyTorch gate order: input, forget, cell(g), output
    i_g = _sigmoid(gates[:, 0:H])
    f_g = _sigmoid(gates[:, H:2 * H])
    g_g = jnp.tanh(gates[:, 2 * H:3 * H])
    o_g = _sigmoid(gates[:, 3 * H:4 * H])

    c_new = f_g * c_ref[...] + i_g * g_g
    h_new = o_g * jnp.tanh(c_new)
    c_ref[...] = c_new
    h_ref[...] = h_new

    # Fused fc epilogue on the final hidden state (single masked store per call).
    @pl.when(t == pl.num_programs(0) - 1)
    def _():
        out = lax.dot_general(h_new, fc_w_ref[...], dimension_numbers=dn,
                              preferred_element_type=jnp.float32)
        o_ref[...] = (out + fc_b_ref[...]).astype(o_ref.dtype)


def lstm_model_forward(x, w_ih, w_hh, b_ih, b_hh, fc_w, fc_b):
    """x: [B, T, D_in]; w_ih: [4H, D_in]; w_hh: [4H, H]; b_*: [4H];
    fc_w: [D_out, H]; fc_b: [D_out]  (native PyTorch layouts). Returns [B, D_out]."""
    B, T, D_in = x.shape
    H4 = w_ih.shape[0]
    H = H4 // 4
    D_out = fc_w.shape[0]

    # Time-major x so each grid step streams one (B, D_in) slab whose last two block
    # dims equal the array dims (clean (8,128) tiling, pipelined DMA per step).
    x_tm = jnp.transpose(x, (1, 0, 2))            # [T, B, D_in]
    b_gates = (b_ih + b_hh).reshape(1, H4)        # fold the two biases once
    fc_b2 = fc_b.reshape(1, D_out)

    return pl.pallas_call(
        lstm_kernel,
        out_shape=jax.ShapeDtypeStruct((B, D_out), x.dtype),
        grid_spec=pltpu.PrefetchScalarGridSpec(
            num_scalar_prefetch=0,
            grid=(T,),
            in_specs=[
                pl.BlockSpec((1, B, D_in), lambda t: (t, 0, 0)),  # x_t, streamed per step
                pl.BlockSpec((H4, D_in), lambda t: (0, 0)),       # W_ih, VMEM-resident
                pl.BlockSpec((H4, H), lambda t: (0, 0)),          # W_hh, VMEM-resident
                pl.BlockSpec((1, H4), lambda t: (0, 0)),          # gate bias, resident
                pl.BlockSpec((D_out, H), lambda t: (0, 0)),       # fc weight, resident
                pl.BlockSpec((1, D_out), lambda t: (0, 0)),       # fc bias, resident
            ],
            out_specs=pl.BlockSpec((B, D_out), lambda t: (0, 0)),  # written at last step
            scratch_shapes=[
                pltpu.VMEM((B, H), jnp.float32),   # h_t, resident across timesteps
                pltpu.VMEM((B, H), jnp.float32),   # c_t, resident across timesteps
            ],
        ),
        compiler_params=pltpu.CompilerParams(
            dimension_semantics=("arbitrary",)),    # recurrence: sequential time grid
    )(x_tm, w_ih, w_hh, b_gates, fc_w, fc_b2)


if __name__ == "__main__":
    # Small shapes consistent with the module.
    batch, seq_len, input_dim, hidden_dim, output_dim = 8, 8, 32, 32, 16

    key = jax.random.PRNGKey(0)
    kx, k1, k2, k3, k4, k5, k6 = jax.random.split(key, 7)

    x = jax.random.normal(kx, (batch, seq_len, input_dim), dtype=jnp.float32)
    bound = 1.0 / (hidden_dim ** 0.5)
    w_ih = jax.random.uniform(k1, (4 * hidden_dim, input_dim),
                              minval=-bound, maxval=bound, dtype=jnp.float32)
    w_hh = jax.random.uniform(k2, (4 * hidden_dim, hidden_dim),
                              minval=-bound, maxval=bound, dtype=jnp.float32)
    b_ih = jax.random.uniform(k3, (4 * hidden_dim,),
                              minval=-bound, maxval=bound, dtype=jnp.float32)
    b_hh = jax.random.uniform(k4, (4 * hidden_dim,),
                              minval=-bound, maxval=bound, dtype=jnp.float32)
    fc_w = jax.random.uniform(k5, (output_dim, hidden_dim),
                              minval=-bound, maxval=bound, dtype=jnp.float32)
    fc_b = jax.random.uniform(k6, (output_dim,),
                              minval=-bound, maxval=bound, dtype=jnp.float32)

    out = lstm_model_forward(x, w_ih, w_hh, b_ih, b_hh, fc_w, fc_b)
    out = jax.block_until_ready(out)

    # Pure-JAX reference (same recurrence, PyTorch gate order i, f, g, o).
    def ref_forward(x, w_ih, w_hh, b_ih, b_hh, fc_w, fc_b):
        B, T, _ = x.shape
        H = w_hh.shape[1]
        h = jnp.zeros((B, H), jnp.float32)
        c = jnp.zeros((B, H), jnp.float32)
        for t in range(T):
            gates = x[:, t, :] @ w_ih.T + h @ w_hh.T + b_ih + b_hh
            i = _sigmoid(gates[:, 0:H])
            f = _sigmoid(gates[:, H:2 * H])
            g = jnp.tanh(gates[:, 2 * H:3 * H])
            o = _sigmoid(gates[:, 3 * H:4 * H])
            c = f * c + i * g
            h = o * jnp.tanh(c)
        return h @ fc_w.T + fc_b

    ref = ref_forward(x, w_ih, w_hh, b_ih, b_hh, fc_w, fc_b)
    assert out.shape == (batch, output_dim)
    assert jnp.allclose(out, ref, atol=1e-4, rtol=1e-4), (
        f"max abs err {jnp.max(jnp.abs(out - ref))}")

    print("KERNEL_OK")
</pallas_src>

<mosaic_0001>
module attributes {stable_mosaic.version = 11 : i64} {
  func.func @lstm_kernel(%arg0: i32, %arg1: memref<1x8x32xf32, #tpu.memory_space<vmem>>, %arg2: memref<128x32xf32, #tpu.memory_space<vmem>>, %arg3: memref<128x32xf32, #tpu.memory_space<vmem>>, %arg4: memref<1x128xf32, #tpu.memory_space<vmem>>, %arg5: memref<16x32xf32, #tpu.memory_space<vmem>>, %arg6: memref<1x16xf32, #tpu.memory_space<vmem>>, %arg7: memref<8x16xf32, #tpu.memory_space<vmem>>, %arg8: memref<8x32xf32, #tpu.memory_space<vmem>>, %arg9: memref<8x32xf32, #tpu.memory_space<vmem>>) attributes {dimension_semantics = [#tpu.dimension_semantics<arbitrary>], iteration_bounds = array<i64: 8>, scalar_prefetch = 0 : i64, scratch_operands = 2 : i64, tpu.core_type = #tpu.core_type<tc>, window_params = [{transform_indices = @transform_0, window_bounds = array<i64: 1, 8, 32>}, {pipeline_mode = #tpu.pipeline_mode<synchronous>, transform_indices = @transform_1, window_bounds = array<i64: 128, 32>}, {pipeline_mode = #tpu.pipeline_mode<synchronous>, transform_indices = @transform_2, window_bounds = array<i64: 128, 32>}, {pipeline_mode = #tpu.pipeline_mode<synchronous>, transform_indices = @transform_3, window_bounds = array<i64: 1, 128>}, {pipeline_mode = #tpu.pipeline_mode<synchronous>, transform_indices = @transform_4, window_bounds = array<i64: 16, 32>}, {pipeline_mode = #tpu.pipeline_mode<synchronous>, transform_indices = @transform_5, window_bounds = array<i64: 1, 16>}, {pipeline_mode = #tpu.pipeline_mode<synchronous>, transform_indices = @transform_6, window_bounds = array<i64: 8, 16>}]} {
    %c0_i32 = arith.constant 0 : i32
    %0 = arith.cmpi eq, %arg0, %c0_i32 : i32
    %1 = arith.extui %0 : i1 to i32
    %c0_i32_0 = arith.constant 0 : i32
    %2 = arith.cmpi ne, %1, %c0_i32_0 : i32
    scf.if %2 {
      %cst_28 = arith.constant 0.000000e+00 : f32
      %51 = vector.broadcast %cst_28 : f32 to vector<8x32xf32>
      %c0_29 = arith.constant 0 : index
      %c0_30 = arith.constant 0 : index
      %52 = vector.load %arg8[%c0_29, %c0_30] : memref<8x32xf32, #tpu.memory_space<vmem>>, vector<8x32xf32>
      tpu.vector_store %arg8[%c0_29, %c0_30], %51 {strides = array<i32>} : memref<8x32xf32, #tpu.memory_space<vmem>>, vector<8x32xf32>,
      %cst_31 = arith.constant 0.000000e+00 : f32
      %53 = vector.broadcast %cst_31 : f32 to vector<8x32xf32>
      %c0_32 = arith.constant 0 : index
      %c0_33 = arith.constant 0 : index
      %54 = vector.load %arg9[%c0_32, %c0_33] : memref<8x32xf32, #tpu.memory_space<vmem>>, vector<8x32xf32>
      tpu.vector_store %arg9[%c0_32, %c0_33], %53 {strides = array<i32>} : memref<8x32xf32, #tpu.memory_space<vmem>>, vector<8x32xf32>,
    } else {
    }
    %c0 = arith.constant 0 : index
    %c0_1 = arith.constant 0 : index
    %c0_2 = arith.constant 0 : index
    %3 = vector.load %arg1[%c0, %c0_1, %c0_2] : memref<1x8x32xf32, #tpu.memory_space<vmem>>, vector<1x8x32xf32>
    %4 = vector.shape_cast %3 : vector<1x8x32xf32> to vector<8x32xf32>
    %c0_3 = arith.constant 0 : index
    %c0_4 = arith.constant 0 : index
    %5 = vector.load %arg2[%c0_3, %c0_4] : memref<128x32xf32, #tpu.memory_space<vmem>>, vector<128x32xf32>
    %cst = arith.constant dense<0.000000e+00> : vector<8x128xf32>
    %6 = tpu.matmul %4, %5, %cst {dimension_numbers = #tpu.dot_dimension_numbers<[1], [1], [0], [0], [0, 0, 1, 0], [], []>} : vector<8x32xf32>, vector<128x32xf32>, vector<8x128xf32> -> vector<8x128xf32>
    %c0_5 = arith.constant 0 : index
    %c0_6 = arith.constant 0 : index
    %7 = vector.load %arg8[%c0_5, %c0_6] : memref<8x32xf32, #tpu.memory_space<vmem>>, vector<8x32xf32>
    %c0_7 = arith.constant 0 : index
    %c0_8 = arith.constant 0 : index
    %8 = vector.load %arg3[%c0_7, %c0_8] : memref<128x32xf32, #tpu.memory_space<vmem>>, vector<128x32xf32>
    %cst_9 = arith.constant dense<0.000000e+00> : vector<8x128xf32>
    %9 = tpu.matmul %7, %8, %cst_9 {dimension_numbers = #tpu.dot_dimension_numbers<[1], [1], [0], [0], [0, 0, 1, 0], [], []>} : vector<8x32xf32>, vector<128x32xf32>, vector<8x128xf32> -> vector<8x128xf32>
    %10 = arith.addf %6, %9 : vector<8x128xf32>
    %c0_10 = arith.constant 0 : index
    %c0_11 = arith.constant 0 : index
    %11 = vector.load %arg4[%c0_10, %c0_11] : memref<1x128xf32, #tpu.memory_space<vmem>>, vector<1x128xf32>
    %12 = vector.broadcast %11 : vector<1x128xf32> to vector<8x128xf32>
    %13 = arith.addf %10, %12 : vector<8x128xf32>
    %14 = vector.extract_strided_slice %13 {offsets = [0, 0], sizes = [8, 32], strides = [1, 1]} : vector<8x128xf32> to vector<8x32xf32>
    %cst_12 = arith.constant 0.000000e+00 : f32
    %15 = vector.broadcast %cst_12 : f32 to vector<8x32xf32>
    %16 = arith.subf %15, %14 : vector<8x32xf32>
    %17 = math.exp %16 : vector<8x32xf32>
    %cst_13 = arith.constant 1.000000e+00 : f32
    %18 = vector.broadcast %cst_13 : f32 to vector<8x32xf32>
    %19 = arith.addf %18, %17 : vector<8x32xf32>
    %cst_14 = arith.constant 1.000000e+00 : f32
    %20 = vector.broadcast %cst_14 : f32 to vector<8x32xf32>
    %21 = arith.divf %20, %19 : vector<8x32xf32>
    %22 = vector.extract_strided_slice %13 {offsets = [0, 32], sizes = [8, 32], strides = [1, 1]} : vector<8x128xf32> to vector<8x32xf32>
    %cst_15 = arith.constant 0.000000e+00 : f32
    %23 = vector.broadcast %cst_15 : f32 to vector<8x32xf32>
    %24 = arith.subf %23, %22 : vector<8x32xf32>
    %25 = math.exp %24 : vector<8x32xf32>
    %cst_16 = arith.constant 1.000000e+00 : f32
    %26 = vector.broadcast %cst_16 : f32 to vector<8x32xf32>
    %27 = arith.addf %26, %25 : vector<8x32xf32>
    %cst_17 = arith.constant 1.000000e+00 : f32
    %28 = vector.broadcast %cst_17 : f32 to vector<8x32xf32>
    %29 = arith.divf %28, %27 : vector<8x32xf32>
    %30 = vector.extract_strided_slice %13 {offsets = [0, 64], sizes = [8, 32], strides = [1, 1]} : vector<8x128xf32> to vector<8x32xf32>
    %31 = math.tanh %30 : vector<8x32xf32>
    %32 = vector.extract_strided_slice %13 {offsets = [0, 96], sizes = [8, 32], strides = [1, 1]} : vector<8x128xf32> to vector<8x32xf32>
    %cst_18 = arith.constant 0.000000e+00 : f32
    %33 = vector.broadcast %cst_18 : f32 to vector<8x32xf32>
    %34 = arith.subf %33, %32 : vector<8x32xf32>
    %35 = math.exp %34 : vector<8x32xf32>
    %cst_19 = arith.constant 1.000000e+00 : f32
    %36 = vector.broadcast %cst_19 : f32 to vector<8x32xf32>
    %37 = arith.addf %36, %35 : vector<8x32xf32>
    %cst_20 = arith.constant 1.000000e+00 : f32
    %38 = vector.broadcast %cst_20 : f32 to vector<8x32xf32>
    %39 = arith.divf %38, %37 : vector<8x32xf32>
    %c0_21 = arith.constant 0 : index
    %c0_22 = arith.constant 0 : index
    %40 = vector.load %arg9[%c0_21, %c0_22] : memref<8x32xf32, #tpu.memory_space<vmem>>, vector<8x32xf32>
    %41 = arith.mulf %29, %40 : vector<8x32xf32>
    %42 = arith.mulf %21, %31 : vector<8x32xf32>
    %43 = arith.addf %41, %42 : vector<8x32xf32>
    %44 = math.tanh %43 : vector<8x32xf32>
    %45 = arith.mulf %39, %44 : vector<8x32xf32>
    %c0_23 = arith.constant 0 : index
    %c0_24 = arith.constant 0 : index
    %46 = vector.load %arg9[%c0_23, %c0_24] : memref<8x32xf32, #tpu.memory_space<vmem>>, vector<8x32xf32>
    tpu.vector_store %arg9[%c0_23, %c0_24], %43 {strides = array<i32>} : memref<8x32xf32, #tpu.memory_space<vmem>>, vector<8x32xf32>,
    %c0_25 = arith.constant 0 : index
    %c0_26 = arith.constant 0 : index
    %47 = vector.load %arg8[%c0_25, %c0_26] : memref<8x32xf32, #tpu.memory_space<vmem>>, vector<8x32xf32>
    tpu.vector_store %arg8[%c0_25, %c0_26], %45 {strides = array<i32>} : memref<8x32xf32, #tpu.memory_space<vmem>>, vector<8x32xf32>,
    %c7_i32 = arith.constant 7 : i32
    %48 = arith.cmpi eq, %arg0, %c7_i32 : i32
    %49 = arith.extui %48 : i1 to i32
    %c0_i32_27 = arith.constant 0 : i32
    %50 = arith.cmpi ne, %49, %c0_i32_27 : i32
    scf.if %50 {
      %c0_28 = arith.constant 0 : index
      %c0_29 = arith.constant 0 : index
      %51 = vector.load %arg5[%c0_28, %c0_29] : memref<16x32xf32, #tpu.memory_space<vmem>>, vector<16x32xf32>
      %cst_30 = arith.constant dense<0.000000e+00> : vector<8x16xf32>
      %52 = tpu.matmul %45, %51, %cst_30 {dimension_numbers = #tpu.dot_dimension_numbers<[1], [1], [0], [0], [0, 0, 1, 0], [], []>} : vector<8x32xf32>, vector<16x32xf32>, vector<8x16xf32> -> vector<8x16xf32>
      %c0_31 = arith.constant 0 : index
      %c0_32 = arith.constant 0 : index
      %53 = vector.load %arg6[%c0_31, %c0_32] : memref<1x16xf32, #tpu.memory_space<vmem>>, vector<1x16xf32>
      %54 = vector.broadcast %53 : vector<1x16xf32> to vector<8x16xf32>
      %55 = arith.addf %52, %54 : vector<8x16xf32>
      %c0_33 = arith.constant 0 : index
      %c0_34 = arith.constant 0 : index
      %56 = vector.load %arg7[%c0_33, %c0_34] : memref<8x16xf32, #tpu.memory_space<vmem>>, vector<8x16xf32>
      tpu.vector_store %arg7[%c0_33, %c0_34], %55 {strides = array<i32>} : memref<8x16xf32, #tpu.memory_space<vmem>>, vector<8x16xf32>,
    } else {
    }
    return
  }
  func.func @transform_0(%arg0: i32) -> (i32, i32, i32) {
    %c0_i32 = arith.constant 0 : i32
    %c0_i32_0 = arith.constant 0 : i32
    %c0_i32_1 = arith.constant 0 : i32
    return %arg0, %c0_i32, %c0_i32_0 : i32, i32, i32
  }
  func.func @transform_1(%arg0: i32) -> (i32, i32) {
    %c0_i32 = arith.constant 0 : i32
    %c0_i32_0 = arith.constant 0 : i32
    %c0_i32_1 = arith.constant 0 : i32
    return %c0_i32, %c0_i32_0 : i32, i32
  }
  func.func @transform_2(%arg0: i32) -> (i32, i32) {
    %c0_i32 = arith.constant 0 : i32
    %c0_i32_0 = arith.constant 0 : i32
    %c0_i32_1 = arith.constant 0 : i32
    return %c0_i32, %c0_i32_0 : i32, i32
  }
  func.func @transform_3(%arg0: i32) -> (i32, i32) {
    %c0_i32 = arith.constant 0 : i32
    %c0_i32_0 = arith.constant 0 : i32
    %c0_i32_1 = arith.constant 0 : i32
    return %c0_i32, %c0_i32_0 : i32, i32
  }
  func.func @transform_4(%arg0: i32) -> (i32, i32) {
    %c0_i32 = arith.constant 0 : i32
    %c0_i32_0 = arith.constant 0 : i32
    %c0_i32_1 = arith.constant 0 : i32
    return %c0_i32, %c0_i32_0 : i32, i32
  }
  func.func @transform_5(%arg0: i32) -> (i32, i32) {
    %c0_i32 = arith.constant 0 : i32
    %c0_i32_0 = arith.constant 0 : i32
    %c0_i32_1 = arith.constant 0 : i32
    return %c0_i32, %c0_i32_0 : i32, i32
  }
  func.func @transform_6(%arg0: i32) -> (i32, i32) {
    %c0_i32 = arith.constant 0 : i32
    %c0_i32_0 = arith.constant 0 : i32
    %c0_i32_1 = arith.constant 0 : i32
    return %c0_i32, %c0_i32_0 : i32, i32
  }
}

</mosaic_0001>

<bundles_post_ra>
// kernel: tpu_custom_call.1
= control target key start
LH: loop header
LB: loop body
LE: loop exit
PB: predicated region body
PF: predicated region fallthrough
CT: control target
= control target key end

     0   :  { %11 = vsyncpa [#allocation5], 0  ;;  %s980_s21 = smov 0   ;;  %s1196_s0 = inlined_call_operand.vmem [shape: f32[8,8,32], index: 0, kind: input, shape index: {}]   ;;  %s1197_s1 = inlined_call_operand.vmem [shape: f32[128,32], index: 1, kind: input, shape index: {}]   ;;  %s1198_s2 = inlined_call_operand.vmem [shape: f32[128,32], index: 2, kind: input, shape index: {}]   ;;  %s1199_s3 = inlined_call_operand.vmem [shape: f32[1,128], index: 3, kind: input, shape index: {}]   ;;  %s1200_s4 = inlined_call_operand.vmem [shape: f32[16,32], index: 4, kind: input, shape index: {}]   ;;  %s1201_s5 = inlined_call_operand.vmem [shape: f32[1,16], index: 5, kind: input, shape index: {}]   ;;  %s1202_s6 = inlined_call_operand.hbm [shape: f32[8,16], index: 6, kind: output, shape index: {}]  }
   0x1 LB: > { %s986_s22 = sadd.s32 4294967295, %s934_s21   ;;  %p708_p0 = scmp.ge.s32.totalorder %s934_s21, 1  ;;  %s934_s21 = sphi %s980_s21, %s17_s21  }
   0x2   : > { %p207_p1 = scmp.lt.s32.totalorder %s934_s21, 9 }
   0x4   : > { %p208_p2 = pnand %p708_p0, %p207_p1 }
   0x5   : > { %p231_p3 = scmp.lt.s32.totalorder (!%p208_p2), %s986_s22, 7  ;;  %p710_p4 = scmp.ne.s32.totalorder (!%p208_p2), %s986_s22, 0 }
   0x6   : > { %211 = sbr.rel (%p208_p2) target bundleno = 996 (0x3e4), region = 44 }
   0xb   : > { %s232_s23 = scalar_select %p231_p3, %s986_s22, 7 }
   0xc   : > { %238 = sbr.rel (%p710_p4) target bundleno = 19 (0x13), region = 48 }
   0xd   : > { %s709_s24 = sshll.u32 %s232_s23, 3 }
   0xe   : > { %s995_s27 = scalar_lea.vmem %s1196_s0, %s709_s24 }
  0x11   : > { %vm239_vm0 = vcmask 261120   ;;  %v936_v0 = vmov 0.0  }
  0x12   : > { %240 = vst.msk [vmem:[#allocation2] sm:$0xff] %vm239_vm0, %v936_v0  ;;  %241 = vst.msk [vmem:[#allocation3] sm:$0xff] %vm239_vm0, %v936_v0 }
  0x13 PF: > { %v275_v1 = vld [vmem:[%s1198_s2 + $0x78] sm:$0xff]  ;;  %vm276_vm1 = vcmask 261120   ;;  %v937_v3 = vmov 0.0   ;;  %v274_v4 = vld [vmem:[%s1198_s2 + $0x70] sm:$0xff]  ;;  %vm938_vm2 = vmmov 0   ;;  %v273_v6 = vld [vmem:[%s1198_s2 + $0x68] sm:$0xff] }
  0x14   : > { %v258_v2 = vld [vmem:[%s1197_s1 + $0x78] sm:$0xff]  ;;  %792 = vmatprep.subr.mxu0 %v937_v3  ;;  %827 = vmatprep.subr.mxu1 %v937_v3  ;;  %v257_v5 = vld [vmem:[%s1197_s1 + $0x70] sm:$0xff]  ;;  %v256_v7 = vld [vmem:[%s1197_s1 + $0x68] sm:$0xff]  ;;  %s939_s7 = smov 64   ;;  %s941_s8 = smov 96  }
  0x15   : > { %793 = vmatpush3.xpose.msk.msra.mxu0 %vm276_vm1, %v275_v1  ;;  %828 = vmatpush3.xpose.msk.msra.mxu1 %vm276_vm1, %v258_v2  ;;  %v272_v8 = vld [vmem:[%s1198_s2 + $0x60] sm:$0xff]  ;;  %v271_v10 = vld [vmem:[%s1198_s2 + $0x58] sm:$0xff]  ;;  %v270_v12 = vld [vmem:[%s1198_s2 + $0x50] sm:$0xff]  ;;  %p746_p5 = scmp.ne.s32.totalorder %s986_s22, 7 }
  0x16   : > { %794 = vmatprep.subr.mxu0 %v937_v3  ;;  %829 = vmatprep.subr.mxu1 %v937_v3  ;;  %v255_v9 = vld [vmem:[%s1197_s1 + $0x60] sm:$0xff]  ;;  %v254_v11 = vld [vmem:[%s1197_s1 + $0x58] sm:$0xff]  ;;  %v253_v13 = vld [vmem:[%s1197_s1 + $0x50] sm:$0xff] }
  0x17   : > { %824 = vmatprep.mubr.msk.f32.mxu0 %vm938_vm2, %v937_v3  ;;  %859 = vmatprep.mubr.msk.f32.mxu1 %vm938_vm2, %v937_v3  ;;  %v269_v14 = vld [vmem:[%s1198_s2 + $0x48] sm:$0xff]  ;;  %v268_v16 = vld [vmem:[%s1198_s2 + $0x40] sm:$0xff]  ;;  %v267_v18 = vld [vmem:[%s1198_s2 + $0x38] sm:$0xff] }
  0x18   : > { %v252_v15 = vld [vmem:[%s1197_s1 + $0x48] sm:$0xff]  ;;  %v251_v17 = vld [vmem:[%s1197_s1 + $0x40] sm:$0xff]  ;;  %v250_v19 = vld [vmem:[%s1197_s1 + $0x38] sm:$0xff] }
  0x19   : > { %795 = vmatpush3.xpose.msk.msra.mxu0 %vm276_vm1, %v274_v4  ;;  %830 = vmatpush3.xpose.msk.msra.mxu1 %vm276_vm1, %v257_v5  ;;  %v266_v20 = vld [vmem:[%s1198_s2 + $0x30] sm:$0xff]  ;;  %v265_v22 = vld [vmem:[%s1198_s2 + $0x28] sm:$0xff]  ;;  %v264_v24 = vld [vmem:[%s1198_s2 + $0x20] sm:$0xff] }
  0x1a   : > { %796 = vmatprep.subr.mxu0 %v937_v3  ;;  %831 = vmatprep.subr.mxu1 %v937_v3  ;;  %v249_v21 = vld [vmem:[%s1197_s1 + $0x30] sm:$0xff]  ;;  %v248_v23 = vld [vmem:[%s1197_s1 + $0x28] sm:$0xff]  ;;  %v247_v25 = vld [vmem:[%s1197_s1 + $0x20] sm:$0xff] }
  0x1b   : > { %v263_v26 = vld [vmem:[%s1198_s2 + $0x18] sm:$0xff]  ;;  %v262_v28 = vld [vmem:[%s1198_s2 + $0x10] sm:$0xff]  ;;  %v261_v30 = vld [vmem:[%s1198_s2 + $0x8] sm:$0xff] }
  0x1c   : > { %v246_v27 = vld [vmem:[%s1197_s1 + $0x18] sm:$0xff]  ;;  %v245_v29 = vld [vmem:[%s1197_s1 + $0x10] sm:$0xff]  ;;  %v244_v31 = vld [vmem:[%s1197_s1 + $0x8] sm:$0xff] }
  0x1d   : > { %797 = vmatpush3.xpose.msk.msra.mxu0 %vm276_vm1, %v273_v6  ;;  %832 = vmatpush3.xpose.msk.msra.mxu1 %vm276_vm1, %v256_v7  ;;  %v260_v32 = vld [vmem:[%s1198_s2] sm:$0xff]  ;;  %v534_v44 = vld [vmem:[#allocation3] sm:$0xff] }
  0x1e   : > { %798 = vmatprep.subr.mxu0 %v937_v3  ;;  %833 = vmatprep.subr.mxu1 %v937_v3  ;;  %v243_v33 = vld [vmem:[%s1197_s1] sm:$0xff] }
  0x1f   : > { %v259_v34 = vld [vmem:[#allocation2] sm:$0xff] }
  0x20   : > { %v242_v35 = vld [vmem:[%s995_s27] sm:$0xff]  ;;  %s940_s27 = smov 32  }
  0x21   : > { %799 = vmatpush3.xpose.msk.msra.mxu0 %vm276_vm1, %v272_v8  ;;  %834 = vmatpush3.xpose.msk.msra.mxu1 %vm276_vm1, %v255_v9  ;;  %v745_v38 = vld [vmem:[%s1199_s3] ss:$0 sm:$0xff] }
  0x22   : > { %800 = vmatprep.subr.mxu0 %v937_v3  ;;  %835 = vmatprep.subr.mxu1 %v937_v3 }
  0x25   : > { %801 = vmatpush3.xpose.msk.msra.mxu0 %vm276_vm1, %v271_v10  ;;  %836 = vmatpush3.xpose.msk.msra.mxu1 %vm276_vm1, %v254_v11 }
  0x26   : > { %802 = vmatprep.subr.mxu0 %v937_v3  ;;  %837 = vmatprep.subr.mxu1 %v937_v3 }
  0x29   : > { %803 = vmatpush3.xpose.msk.msra.mxu0 %vm276_vm1, %v270_v12  ;;  %838 = vmatpush3.xpose.msk.msra.mxu1 %vm276_vm1, %v253_v13 }
  0x2a   : > { %804 = vmatprep.subr.mxu0 %v937_v3  ;;  %839 = vmatprep.subr.mxu1 %v937_v3 }
  0x2d   : > { %805 = vmatpush3.xpose.msk.msra.mxu0 %vm276_vm1, %v269_v14  ;;  %840 = vmatpush3.xpose.msk.msra.mxu1 %vm276_vm1, %v252_v15 }
  0x2e   : > { %806 = vmatprep.subr.mxu0 %v937_v3  ;;  %841 = vmatprep.subr.mxu1 %v937_v3 }
  0x31   : > { %807 = vmatpush3.xpose.msk.msra.mxu0 %vm276_vm1, %v268_v16  ;;  %842 = vmatpush3.xpose.msk.msra.mxu1 %vm276_vm1, %v251_v17 }
  0x32   : > { %808 = vmatprep.subr.mxu0 %v937_v3  ;;  %843 = vmatprep.subr.mxu1 %v937_v3 }
  0x35   : > { %809 = vmatpush3.xpose.msk.msra.mxu0 %vm276_vm1, %v267_v18  ;;  %844 = vmatpush3.xpose.msk.msra.mxu1 %vm276_vm1, %v250_v19 }
  0x36   : > { %810 = vmatprep.subr.mxu0 %v937_v3  ;;  %845 = vmatprep.subr.mxu1 %v937_v3 }
  0x39   : > { %811 = vmatpush3.xpose.msk.msra.mxu0 %vm276_vm1, %v266_v20  ;;  %846 = vmatpush3.xpose.msk.msra.mxu1 %vm276_vm1, %v249_v21 }
  0x3a   : > { %812 = vmatprep.subr.mxu0 %v937_v3  ;;  %847 = vmatprep.subr.mxu1 %v937_v3 }
  0x3d   : > { %813 = vmatpush3.xpose.msk.msra.mxu0 %vm276_vm1, %v265_v22  ;;  %848 = vmatpush3.xpose.msk.msra.mxu1 %vm276_vm1, %v248_v23 }
  0x3e   : > { %814 = vmatprep.subr.mxu0 %v937_v3  ;;  %849 = vmatprep.subr.mxu1 %v937_v3 }
  0x41   : > { %815 = vmatpush3.xpose.msk.msra.mxu0 %vm276_vm1, %v264_v24  ;;  %850 = vmatpush3.xpose.msk.msra.mxu1 %vm276_vm1, %v247_v25 }
  0x42   : > { %816 = vmatprep.subr.mxu0 %v937_v3  ;;  %851 = vmatprep.subr.mxu1 %v937_v3 }
  0x45   : > { %817 = vmatpush3.xpose.msk.msra.mxu0 %vm276_vm1, %v263_v26  ;;  %852 = vmatpush3.xpose.msk.msra.mxu1 %vm276_vm1, %v246_v27 }
  0x46   : > { %818 = vmatprep.subr.mxu0 %v937_v3  ;;  %853 = vmatprep.subr.mxu1 %v937_v3 }
  0x49   : > { %819 = vmatpush3.xpose.msk.msra.mxu0 %vm276_vm1, %v262_v28  ;;  %854 = vmatpush3.xpose.msk.msra.mxu1 %vm276_vm1, %v245_v29 }
  0x4a   : > { %820 = vmatprep.subr.mxu0 %v937_v3  ;;  %855 = vmatprep.subr.mxu1 %v937_v3 }
  0x4d   : > { %821 = vmatpush3.xpose.msk.msra.mxu0 %vm276_vm1, %v261_v30  ;;  %856 = vmatpush3.xpose.msk.msra.mxu1 %vm276_vm1, %v244_v31 }
  0x4e   : > { %822 = vmatprep.subr.mxu0 %v937_v3  ;;  %857 = vmatprep.subr.mxu1 %v937_v3 }
  0x51   : > { %823 = vmatpush3.xpose.msk.msra.mxu0 %vm276_vm1, %v260_v32  ;;  %858 = vmatpush3.xpose.msk.msra.mxu1 %vm276_vm1, %v243_v33 }
  0x54   : > { %825 = vmatmul.mubr.msk.f32.vlgmr.msra.gmra.mxu0 %vm276_vm1, %v259_v34  ;;  %860 = vmatmul.mubr.msk.f32.vlgmr.msra.gmra.mxu1 %vm276_vm1, %v242_v35 }
 0x114   : > { %v394_v36 = vpop.f32.mrf.mxu0  ;;  %v515_v37 = vpop.f32.mrf.mxu1 }
 0x115   : > { %v516_v39 = vadd.f32 %v515_v37, %v394_v36 }
 0x116   : > { %v826_v40 = vpop.f32.mrf.mxu0  ;;  %v861_v41 = vpop.f32.mrf.mxu1 }
 0x117   : > { %v526_v42 = vadd.f32 %v745_v38, %v516_v39 }
 0x119   : > { %892 = vtanh.f32 %v526_v42  ;;  %v527_v45 = vsub.f32 0.0, %v526_v42 }
 0x11b   : > { %v528_v46 = vmul.f32 1.442695, %v527_v45 }
 0x11d   : > { %894 = vpow2.f32 %v528_v46 }
 0x126   : > { %v893_v43 = vpop.eup %892 }
 0x127   : > { %541 = vrot.lane.b32.xlu0 %v893_v43, %s939_s7 }
 0x12a   : > { %v895_v47 = vpop.eup %894 }
 0x12b   : > { %536 = vrot.lane.b32.xlu0 %v534_v44, %s940_s27  ;;  %v530_v48 = vadd.f32 1.0, %v895_v47 }
 0x12d   : > { %896 = vrcp.f32 %v530_v48 }
 0x13a   : > { %v897_v49 = vpop.eup %896 }
 0x199   : > { %v542_v50 = vpop.permute.xlu0 %541 }
 0x19a   : > { %v544_v51 = vmul.f32 %v897_v49, %v542_v50 }
 0x19c   : > { %546 = vrot.lane.b32.xlu1 %v544_v51, %s940_s27 }
 0x19d   : > { %v537_v52 = vpop.permute.xlu0 %536 }
 0x19e   : > { %v539_v53 = vmul.f32 %v897_v49, %v537_v52 }
 0x20e   : > { %v547_v54 = vpop.permute.xlu1 %546 }
 0x20f   : > { %v549_v55 = vadd.f32 %v547_v54, %v539_v53 }
 0x211   : > { %898 = vtanh.f32 %v549_v55  ;;  %557 = vrot.lane.b32.xlu0 %v549_v55, %s941_s8 }
 0x21e   : > { %v899_v56 = vpop.eup %898 }
 0x21f   : > { %552 = vrot.lane.b32.xlu1 %v899_v56, %s939_s7 }
 0x283   : > { %v558_v57 = vpop.permute.xlu0 %557 }
 0x284   : > { %560 = vst.msk [vmem:[#allocation3] sm:$0xff] %vm276_vm1, %v558_v57 }
 0x291   : > { %v553_v58 = vpop.permute.xlu1 %552 }
 0x292   : > { %v555_v59 = vmul.f32 %v897_v49, %v553_v58 }
 0x294   : > { %562 = vrot.lane.b32.xlu1 %v555_v59, %s940_s27 }
 0x303   : > { %569 = sbr.rel (%p746_p5) target bundleno = 981 (0x3d5), region = 52 }
 0x306   : > { %v563_v60 = vpop.permute.xlu1 %562 }
 0x307   : > { %565 = vst.msk [vmem:[#allocation2] sm:$0xff] %vm276_vm1, %v563_v60 }
 0x308   : > { %v571_v61 = vld [vmem:[%s1200_s4 + $0x8] sm:$0xff]  ;;  %v942_v62 = vmov 0.0   ;;  %vm943_vm3 = vmmov 0   ;;  %v570_v63 = vld [vmem:[%s1200_s4] sm:$0xff]  ;;  %vm657_vm4 = vcmask 130048  }
 0x309   : > { %862 = vmatprep.subr.mxu0 %v942_v62  ;;  %866 = vmatprep.mubr.msk.f32.mxu0 %vm943_vm3, %v942_v62  ;;  %v747_v0 = vld [vmem:[%s1201_s5] ss:$0 sm:$0xff] }
 0x30a   : > { %863 = vmatpush3.xpose.msk.msra.mxu0 %vm276_vm1, %v571_v61 }
 0x30b   : > { %864 = vmatprep.subr.mxu0 %v942_v62 }
 0x30e   : > { %865 = vmatpush3.xpose.msk.msra.mxu0 %vm276_vm1, %v570_v63 }
 0x311   : > { %867 = vmatmul.mubr.msk.f32.vlgmr.msra.gmra.mxu0 %vm276_vm1, %v563_v60 }
 0x3d1   : > { %v653_v1 = vpop.f32.mrf.mxu0 }
 0x3d2   : > { %v654_v2 = vadd.f32 %v747_v0, %v653_v1 }
 0x3d3   : > { %v868_v3 = vpop.f32.mrf.mxu0 }
 0x3d4   : > { %658 = vst.msk [vmem:[#allocation4] sm:$0xff] %vm657_vm4, %v654_v2 }
 0x3d5 PF: > { %p873_p6 = scmp.eq.s32.totalorder %s986_s22, 7  ;;  %s944_s15 = smov [#allocation4]  }
 0x3d6   : > { %s666_s16 = sshll.u32 %s944_s15, 4  ;;  %s667_s16 = int_to_ptr.vmem [resolvable:$true] %s666_s16 }
 0x3d7   : > { %s900_s17 = scalar_lea.vmem %s667_s16, 128  ;;  %p907_p10 = scmp.lt.s32.totalorder %s667_s16, %s667_s16 }
 0x3d8   : > { %p901_p7 = scmp.ne.s32.totalorder %s667_s16, %s900_s17  ;;  %p908_p11 = scmp.lt.s32.totalorder %s900_s17, %s900_s17 }
 0x3da   : > { %p902_p8 = pnand %p901_p7, %p873_p6  ;;  %p909_p12 = por %p908_p11, %p907_p10 }
 0x3dc   : > { %p903_p9 = pneg %p902_p8 }
 0x3de   : > { %p910_p13 = pnand %p909_p12, %p903_p9 }
 0x3e0   : > { %913 = shalt.err (!%p910_p13)
}
 0x3e1   : > { %870 = dma.vmem_to_hbm [thread:$0]  (%p873_p6), %s667_s16, 128, %s1202_s6, [#allocation5]  }
 0x3e2   : > { %929 = dma.done.wait (%p873_p6), [#allocation5], 128  }
 0x3e3   : > { %931 = vsyncadd (%p873_p6), [#allocation5], 4294967168 }
 0x3e4 PF: > { %s17_s21 = sadd.s32 1, %s934_s21  }
 0x3e5   : > { %p14_p0 = scmp.ge.s32.totalorder %s17_s21, 10  }
 0x3e7   :  { %16 = sbr.rel (!%p14_p0) target bundleno = 1 (0x1), region = 79 }
 0x3ec   :  { %679 = vsyncpa [#allocation5], 1 }
 0x3ed   :  { %681 = vsyncpa [#allocation5 + $0x1], 1 }

</bundles_post_ra>
